<compile_context>
chip_gen: v5e
topology: v5e:2x2
jax: 0.10.0
libtpu: 0.0.40
codegen_flags: <defaults>
</compile_context>

<pallas_src>
import functools

import jax
import jax.numpy as jnp
from jax import lax
from jax.experimental import pallas as pl
from jax.experimental.pallas import tpu as pltpu


def _spatial_gate_kernel(x_ref, w_ref, m_ref, b_ref, out_ref, acc_ref, *, H, W, n_b):
    """One (batch-block, channel-tile) step of the 3x3 transposed-conv + sigmoid gate.

    x_ref:   (n_b, c_tile, H*W)       VMEM  flattened input block (source dtype)
    w_ref:   (1, 9, c_tile)           VMEM  flipped weights for this channel tile
    m_ref:   (9, H*W)            f32  VMEM  per-tap boundary masks (0/1), loaded once
    b_ref:   (1, 1)              f32  SMEM  bias (scalar)
    out_ref: (n_b, 1, H*W)            VMEM  sigmoid(conv) for this batch block
    acc_ref: (n_b, 9, H*W)       f32  VMEM  unshifted per-tap channel sums across k
    """
    HW = H * W
    k = pl.program_id(1)

    @pl.when(k == 0)
    def _init():
        acc_ref[...] = jnp.zeros_like(acc_ref)

    # MXU: per-tap weighted channel partial sums, (9, c_tile) @ (c_tile, HW) -> (9, HW).
    w_k = w_ref[0]
    for b in range(n_b):                          # small static unroll over the batch block
        acc_ref[b] = acc_ref[b] + jnp.dot(
            w_k, x_ref[b], preferred_element_type=jnp.float32)

    # Epilogue (once per batch block, not per channel tile): shift each tap to its
    # destination pixel (1-px halo via roll + precomputed masks), sum taps, bias, sigmoid.
    @pl.when(k == pl.num_programs(1) - 1)
    def _epilogue():
        bias = b_ref[0, 0]
        masks = m_ref[...]                        # (9, HW) f32 in {0, 1}
        for b in range(n_b):
            taps = acc_ref[b]                     # (9, HW) f32
            total = jnp.zeros((1, HW), jnp.float32)
            for t in range(9):                    # 9 taps, unrolled
                dp, dq = t // 3 - 1, t % 3 - 1
                s_t = taps[t:t + 1, :]
                # Align so position j holds the (h+dp, w+dq) neighbour: y[j] = S[j + dp*W + dq].
                shift = (-(dp * W + dq)) % HW
                if shift:
                    s_t = pltpu.roll(s_t, shift=shift, axis=1)   # XLU slot
                total = total + s_t * masks[t:t + 1, :]          # mask applied per tap
            out_ref[b] = jax.nn.sigmoid(total + bias).astype(out_ref.dtype)


def _vmem_limit_bytes():
    """Generation-aware VMEM budget: ~48 MiB on v7x (64 MiB physical), ~96 MiB on v5e/v6e."""
    cap = 128 * 1024 * 1024
    try:
        hw_cap = int(pltpu.get_tpu_info().vmem_capacity_bytes)
        if hw_cap > 0:
            cap = hw_cap
    except Exception:   # interpret mode / older runtimes: keep the conservative default
        pass
    return int(min(cap * 3 // 4, 96 * 1024 * 1024))


def _pick_c_tile(c_pad, bytes_per_chan, budget):
    """Largest multiple-of-8 divisor of c_pad whose (c_tile, HW) x block fits the budget."""
    if c_pad * bytes_per_chan <= budget:
        return c_pad
    fitting = [d for d in range(8, c_pad, 8)
               if c_pad % d == 0 and d * bytes_per_chan <= budget]
    if fitting:
        return max(fitting)
    return 8    # smallest legal tile (only exceeds budget for absurdly large H*W)


def _pick_n_batch(n, bytes_per_batch, budget, target=1 << 20):
    """Fold batch elements into one block until the input DMA is ~>= target (budget-bound)."""
    best = 1
    for d in range(1, n + 1):
        if n % d:
            continue
        if d * bytes_per_batch > budget:
            break
        best = d
        if d * bytes_per_batch >= target:
            break
    return best


def spatial_gate(x, weight, bias):
    """x: (N, C, H, W). weight: (C, 1, 3, 3) ConvTranspose2d layout. bias: (1,)."""
    N, C, H, W = x.shape
    HW = H * W
    dtype = x.dtype
    itemsize = jnp.dtype(dtype).itemsize

    # ConvTranspose2d(k=3, s=1, p=1) == correlation with the spatially flipped kernel
    # and pad=1.  Tap order t = (dp+1)*3 + (dq+1), dp/dq in {-1, 0, +1}.
    w_flip = weight[:, 0, ::-1, ::-1].reshape(C, 9).astype(dtype)     # (C, 9)
    b2 = bias.astype(jnp.float32).reshape(1, 1)

    x3 = x.reshape(N, C, HW)                      # free: merges minor dims, keeps dtype

    # Keep the channel (contraction / sublane) dim a multiple of 8.  Real PAFPN channel
    # counts already are; otherwise this is a rare-path extra HBM pad pass.
    c_pad = ((C + 7) // 8) * 8
    if c_pad != C:
        x3 = jnp.pad(x3, ((0, 0), (0, c_pad - C), (0, 0)))
        w_flip = jnp.pad(w_flip, ((0, c_pad - C), (0, 0)))   # zero weights -> no contribution

    vmem_limit = _vmem_limit_bytes()
    block_budget = vmem_limit // 6                # x block is double-buffered; acc/out headroom

    c_tile = _pick_c_tile(c_pad, HW * itemsize, block_budget)
    n_k = c_pad // c_tile
    n_b = _pick_n_batch(N, c_tile * HW * itemsize, block_budget)
    grid = (N // n_b, n_k)
    # TODO(synk): for N == 1 on v7x (2 TensorCores) add a spatial (H) grid axis with a
    # 1-row halo so a second "parallel" axis keeps both cores busy.

    # Weight tiles laid out so every BlockSpec dim is either full-extent or a multiple
    # of 8: (n_k, 9, c_tile), ready for a plain (9, c_tile) @ (c_tile, HW) MXU matmul.
    w_tiles = jnp.transpose(w_flip).reshape(9, n_k, c_tile).transpose(1, 0, 2)

    # Per-tap destination-pixel validity masks for the 1-px zero halo (precomputed once).
    idx = jnp.arange(HW, dtype=jnp.int32)
    row, col = idx // W, idx % W
    mask9 = jnp.stack(
        [((row + (t // 3 - 1) >= 0) & (row + (t // 3 - 1) < H) &
          (col + (t % 3 - 1) >= 0) & (col + (t % 3 - 1) < W))
         for t in range(9)], axis=0).astype(jnp.float32)              # (9, HW)

    kernel = functools.partial(_spatial_gate_kernel, H=H, W=W, n_b=n_b)

    out = pl.pallas_call(
        kernel,
        out_shape=jax.ShapeDtypeStruct((N, 1, HW), dtype),
        grid_spec=pltpu.PrefetchScalarGridSpec(
            num_scalar_prefetch=0,
            grid=grid,
            in_specs=[
                pl.BlockSpec((n_b, c_tile, HW), lambda nb, k: (nb, k, 0)),   # x
                pl.BlockSpec((1, 9, c_tile), lambda nb, k: (k, 0, 0)),       # weights
                pl.BlockSpec((9, HW), lambda nb, k: (0, 0)),                 # tap masks
                pl.BlockSpec(memory_space=pltpu.MemorySpace.SMEM),           # bias scalar
            ],
            out_specs=pl.BlockSpec((n_b, 1, HW), lambda nb, k: (nb, 0, 0)),
            scratch_shapes=[pltpu.VMEM((n_b, 9, HW), jnp.float32)],
        ),
        compiler_params=pltpu.CompilerParams(
            dimension_semantics=("parallel", "arbitrary"),
            vmem_limit_bytes=vmem_limit,
        ),
    )(x3, w_tiles, mask9, b2)

    return out.reshape(N, 1, H, W)


def _reference(x, weight, bias):
    """Pure-JAX reference: ConvTranspose2d(s=1, p=1) == conv with flipped kernel, pad=1."""
    w_eff = weight[:, 0, ::-1, ::-1][jnp.newaxis].astype(jnp.float32)   # (1, C, 3, 3) OIHW
    y = lax.conv_general_dilated(
        x.astype(jnp.float32), w_eff, window_strides=(1, 1),
        padding=((1, 1), (1, 1)),
        dimension_numbers=("NCHW", "OIHW", "NCHW"),
        precision=lax.Precision.HIGHEST)
    return jax.nn.sigmoid(y + bias[0])


if __name__ == "__main__":
    N, C, H, W = 2, 4, 16, 16
    key = jax.random.PRNGKey(0)
    kx, kw, kb = jax.random.split(key, 3)

    x = jax.random.normal(kx, (N, C, H, W), dtype=jnp.float32)
    # Deterministic init mimicking PyTorch's uniform(-1/sqrt(fan_in), +1/sqrt(fan_in)).
    fan_in = C * 3 * 3
    bound = 1.0 / (fan_in ** 0.5)
    weight = jax.random.uniform(kw, (C, 1, 3, 3), jnp.float32, -bound, bound)
    bias = jax.random.uniform(kb, (1,), jnp.float32, -bound, bound)

    out = jax.block_until_ready(spatial_gate(x, weight, bias))
    ref = jax.block_until_ready(_reference(x, weight, bias))

    assert out.shape == (N, 1, H, W)
    # MXU f32 matmuls may run as bf16 passes at default precision -> allow ~1e-3 slack.
    assert jnp.allclose(out, ref, atol=2e-3, rtol=2e-3), float(jnp.max(jnp.abs(out - ref)))
    print("KERNEL_OK")
</pallas_src>

<mosaic_0001>
module attributes {stable_mosaic.version = 11 : i64} {
  func.func @_spatial_gate_kernel(%arg0: i32, %arg1: i32, %arg2: memref<2x8x256xf32, #tpu.memory_space<vmem>>, %arg3: memref<1x9x8xf32, #tpu.memory_space<vmem>>, %arg4: memref<9x256xf32, #tpu.memory_space<vmem>>, %arg5: memref<1x1xf32, #tpu.memory_space<smem>>, %arg6: memref<2x1x256xf32, #tpu.memory_space<vmem>>, %arg7: memref<2x9x256xf32, #tpu.memory_space<vmem>>) attributes {dimension_semantics = [#tpu.dimension_semantics<parallel>, #tpu.dimension_semantics<arbitrary>], iteration_bounds = array<i64: 1, 1>, scalar_prefetch = 0 : i64, scratch_operands = 1 : i64, tpu.core_type = #tpu.core_type<tc>, window_params = [{transform_indices = @transform_0, window_bounds = array<i64: 2, 8, 256>}, {transform_indices = @transform_1, window_bounds = array<i64: 1, 9, 8>}, {pipeline_mode = #tpu.pipeline_mode<synchronous>, transform_indices = @transform_2, window_bounds = array<i64: 9, 256>}, {transform_indices = @transform_3, window_bounds = array<i64: 1, 1>}, {transform_indices = @transform_4, window_bounds = array<i64: 2, 1, 256>}]} {
    %c0_i32 = arith.constant 0 : i32
    %0 = arith.cmpi eq, %arg1, %c0_i32 : i32
    %1 = arith.extui %0 : i1 to i32
    %c0_i32_0 = arith.constant 0 : i32
    %2 = arith.cmpi ne, %1, %c0_i32_0 : i32
    scf.if %2 {
      %cst_23 = arith.constant 0.000000e+00 : f32
      %26 = vector.broadcast %cst_23 : f32 to vector<2x9x256xf32>
      %c0_24 = arith.constant 0 : index
      %c0_25 = arith.constant 0 : index
      %c0_26 = arith.constant 0 : index
      %27 = vector.load %arg7[%c0_24, %c0_25, %c0_26] : memref<2x9x256xf32, #tpu.memory_space<vmem>>, vector<2x9x256xf32>
      tpu.vector_store %arg7[%c0_24, %c0_25, %c0_26], %26 {strides = array<i32>} : memref<2x9x256xf32, #tpu.memory_space<vmem>>, vector<2x9x256xf32>,
    } else {
    }
    %c0 = arith.constant 0 : index
    %c0_1 = arith.constant 0 : index
    %c0_2 = arith.constant 0 : index
    %3 = vector.load %arg3[%c0, %c0_1, %c0_2] : memref<1x9x8xf32, #tpu.memory_space<vmem>>, vector<1x9x8xf32>
    %4 = vector.shape_cast %3 : vector<1x9x8xf32> to vector<9x8xf32>
    %c0_3 = arith.constant 0 : index
    %c0_4 = arith.constant 0 : index
    %c0_5 = arith.constant 0 : index
    %5 = vector.load %arg7[%c0_3, %c0_4, %c0_5] : memref<2x9x256xf32, #tpu.memory_space<vmem>>, vector<1x9x256xf32>
    %6 = vector.shape_cast %5 : vector<1x9x256xf32> to vector<9x256xf32>
    %c0_6 = arith.constant 0 : index
    %c0_7 = arith.constant 0 : index
    %c0_8 = arith.constant 0 : index
    %7 = vector.load %arg2[%c0_6, %c0_7, %c0_8] : memref<2x8x256xf32, #tpu.memory_space<vmem>>, vector<1x8x256xf32>
    %8 = vector.shape_cast %7 : vector<1x8x256xf32> to vector<8x256xf32>
    %cst = arith.constant dense<0.000000e+00> : vector<9x256xf32>
    %9 = tpu.matmul %4, %8, %cst {dimension_numbers = #tpu.dot_dimension_numbers<[1], [0], [0], [1], [0, 0, 1, 1], [], []>} : vector<9x8xf32>, vector<8x256xf32>, vector<9x256xf32> -> vector<9x256xf32>
    %10 = arith.addf %6, %9 : vector<9x256xf32>
    %c0_9 = arith.constant 0 : index
    %c0_10 = arith.constant 0 : index
    %c0_11 = arith.constant 0 : index
    %11 = vector.load %arg7[%c0_9, %c0_10, %c0_11] : memref<2x9x256xf32, #tpu.memory_space<vmem>>, vector<1x9x256xf32>
    %12 = vector.shape_cast %11 : vector<1x9x256xf32> to vector<9x256xf32>
    %13 = vector.shape_cast %10 : vector<9x256xf32> to vector<1x9x256xf32>
    tpu.vector_store %arg7[%c0_9, %c0_10, %c0_11], %13 {strides = array<i32>} : memref<2x9x256xf32, #tpu.memory_space<vmem>>, vector<1x9x256xf32>,
    %c1 = arith.constant 1 : index
    %c0_12 = arith.constant 0 : index
    %c0_13 = arith.constant 0 : index
    %14 = vector.load %arg7[%c1, %c0_12, %c0_13] : memref<2x9x256xf32, #tpu.memory_space<vmem>>, vector<1x9x256xf32>
    %15 = vector.shape_cast %14 : vector<1x9x256xf32> to vector<9x256xf32>
    %c1_14 = arith.constant 1 : index
    %c0_15 = arith.constant 0 : index
    %c0_16 = arith.constant 0 : index
    %16 = vector.load %arg2[%c1_14, %c0_15, %c0_16] : memref<2x8x256xf32, #tpu.memory_space<vmem>>, vector<1x8x256xf32>
    %17 = vector.shape_cast %16 : vector<1x8x256xf32> to vector<8x256xf32>
    %cst_17 = arith.constant dense<0.000000e+00> : vector<9x256xf32>
    %18 = tpu.matmul %4, %17, %cst_17 {dimension_numbers = #tpu.dot_dimension_numbers<[1], [0], [0], [1], [0, 0, 1, 1], [], []>} : vector<9x8xf32>, vector<8x256xf32>, vector<9x256xf32> -> vector<9x256xf32>
    %19 = arith.addf %15, %18 : vector<9x256xf32>
    %c1_18 = arith.constant 1 : index
    %c0_19 = arith.constant 0 : index
    %c0_20 = arith.constant 0 : index
    %20 = vector.load %arg7[%c1_18, %c0_19, %c0_20] : memref<2x9x256xf32, #tpu.memory_space<vmem>>, vector<1x9x256xf32>
    %21 = vector.shape_cast %20 : vector<1x9x256xf32> to vector<9x256xf32>
    %22 = vector.shape_cast %19 : vector<9x256xf32> to vector<1x9x256xf32>
    tpu.vector_store %arg7[%c1_18, %c0_19, %c0_20], %22 {strides = array<i32>} : memref<2x9x256xf32, #tpu.memory_space<vmem>>, vector<1x9x256xf32>,
    %c0_i32_21 = arith.constant 0 : i32
    %23 = arith.cmpi eq, %arg1, %c0_i32_21 : i32
    %24 = arith.extui %23 : i1 to i32
    %c0_i32_22 = arith.constant 0 : i32
    %25 = arith.cmpi ne, %24, %c0_i32_22 : i32
    scf.if %25 {
      %c0_23 = arith.constant 0 : index
      %c0_24 = arith.constant 0 : index
      %26 = memref.load %arg5[%c0_23, %c0_24] : memref<1x1xf32, #tpu.memory_space<smem>>
      %c0_25 = arith.constant 0 : index
      %c0_26 = arith.constant 0 : index
      %27 = vector.load %arg4[%c0_25, %c0_26] : memref<9x256xf32, #tpu.memory_space<vmem>>, vector<9x256xf32>
      %c0_27 = arith.constant 0 : index
      %c0_28 = arith.constant 0 : index
      %c0_29 = arith.constant 0 : index
      %28 = vector.load %arg7[%c0_27, %c0_28, %c0_29] : memref<2x9x256xf32, #tpu.memory_space<vmem>>, vector<1x9x256xf32>
      %29 = vector.shape_cast %28 : vector<1x9x256xf32> to vector<9x256xf32>
      %cst_30 = arith.constant 0.000000e+00 : f32
      %30 = vector.broadcast %cst_30 : f32 to vector<1x256xf32>
      %31 = vector.extract_strided_slice %29 {offsets = [0, 0], sizes = [1, 256], strides = [1, 1]} : vector<9x256xf32> to vector<1x256xf32>
      %c17_i32 = arith.constant 17 : i32
      %32 = tpu.dynamic_rotate %31 by %c17_i32 dim 1 : vector<1x256xf32>, i32 -> vector<1x256xf32>
      %33 = vector.extract_strided_slice %27 {offsets = [0, 0], sizes = [1, 256], strides = [1, 1]} : vector<9x256xf32> to vector<1x256xf32>
      %34 = arith.mulf %32, %33 : vector<1x256xf32>
      %35 = arith.addf %30, %34 : vector<1x256xf32>
      %36 = vector.extract_strided_slice %29 {offsets = [1, 0], sizes = [1, 256], strides = [1, 1]} : vector<9x256xf32> to vector<1x256xf32>
      %c16_i32 = arith.constant 16 : i32
      %37 = tpu.dynamic_rotate %36 by %c16_i32 dim 1 : vector<1x256xf32>, i32 -> vector<1x256xf32>
      %38 = vector.extract_strided_slice %27 {offsets = [1, 0], sizes = [1, 256], strides = [1, 1]} : vector<9x256xf32> to vector<1x256xf32>
      %39 = arith.mulf %37, %38 : vector<1x256xf32>
      %40 = arith.addf %35, %39 : vector<1x256xf32>
      %41 = vector.extract_strided_slice %29 {offsets = [2, 0], sizes = [1, 256], strides = [1, 1]} : vector<9x256xf32> to vector<1x256xf32>
      %c15_i32 = arith.constant 15 : i32
      %42 = tpu.dynamic_rotate %41 by %c15_i32 dim 1 : vector<1x256xf32>, i32 -> vector<1x256xf32>
      %43 = vector.extract_strided_slice %27 {offsets = [2, 0], sizes = [1, 256], strides = [1, 1]} : vector<9x256xf32> to vector<1x256xf32>
      %44 = arith.mulf %42, %43 : vector<1x256xf32>
      %45 = arith.addf %40, %44 : vector<1x256xf32>
      %46 = vector.extract_strided_slice %29 {offsets = [3, 0], sizes = [1, 256], strides = [1, 1]} : vector<9x256xf32> to vector<1x256xf32>
      %c1_i32 = arith.constant 1 : i32
      %47 = tpu.dynamic_rotate %46 by %c1_i32 dim 1 : vector<1x256xf32>, i32 -> vector<1x256xf32>
      %48 = vector.extract_strided_slice %27 {offsets = [3, 0], sizes = [1, 256], strides = [1, 1]} : vector<9x256xf32> to vector<1x256xf32>
      %49 = arith.mulf %47, %48 : vector<1x256xf32>
      %50 = arith.addf %45, %49 : vector<1x256xf32>
      %51 = vector.extract_strided_slice %29 {offsets = [4, 0], sizes = [1, 256], strides = [1, 1]} : vector<9x256xf32> to vector<1x256xf32>
      %52 = vector.extract_strided_slice %27 {offsets = [4, 0], sizes = [1, 256], strides = [1, 1]} : vector<9x256xf32> to vector<1x256xf32>
      %53 = arith.mulf %51, %52 : vector<1x256xf32>
      %54 = arith.addf %50, %53 : vector<1x256xf32>
      %55 = vector.extract_strided_slice %29 {offsets = [5, 0], sizes = [1, 256], strides = [1, 1]} : vector<9x256xf32> to vector<1x256xf32>
      %c255_i32 = arith.constant 255 : i32
      %56 = tpu.dynamic_rotate %55 by %c255_i32 dim 1 : vector<1x256xf32>, i32 -> vector<1x256xf32>
      %57 = vector.extract_strided_slice %27 {offsets = [5, 0], sizes = [1, 256], strides = [1, 1]} : vector<9x256xf32> to vector<1x256xf32>
      %58 = arith.mulf %56, %57 : vector<1x256xf32>
      %59 = arith.addf %54, %58 : vector<1x256xf32>
      %60 = vector.extract_strided_slice %29 {offsets = [6, 0], sizes = [1, 256], strides = [1, 1]} : vector<9x256xf32> to vector<1x256xf32>
      %c241_i32 = arith.constant 241 : i32
      %61 = tpu.dynamic_rotate %60 by %c241_i32 dim 1 : vector<1x256xf32>, i32 -> vector<1x256xf32>
      %62 = vector.extract_strided_slice %27 {offsets = [6, 0], sizes = [1, 256], strides = [1, 1]} : vector<9x256xf32> to vector<1x256xf32>
      %63 = arith.mulf %61, %62 : vector<1x256xf32>
      %64 = arith.addf %59, %63 : vector<1x256xf32>
      %65 = vector.extract_strided_slice %29 {offsets = [7, 0], sizes = [1, 256], strides = [1, 1]} : vector<9x256xf32> to vector<1x256xf32>
      %c240_i32 = arith.constant 240 : i32
      %66 = tpu.dynamic_rotate %65 by %c240_i32 dim 1 : vector<1x256xf32>, i32 -> vector<1x256xf32>
      %67 = vector.extract_strided_slice %27 {offsets = [7, 0], sizes = [1, 256], strides = [1, 1]} : vector<9x256xf32> to vector<1x256xf32>
      %68 = arith.mulf %66, %67 : vector<1x256xf32>
      %69 = arith.addf %64, %68 : vector<1x256xf32>
      %70 = vector.extract_strided_slice %29 {offsets = [8, 0], sizes = [1, 256], strides = [1, 1]} : vector<9x256xf32> to vector<1x256xf32>
      %c239_i32 = arith.constant 239 : i32
      %71 = tpu.dynamic_rotate %70 by %c239_i32 dim 1 : vector<1x256xf32>, i32 -> vector<1x256xf32>
      %72 = vector.extract_strided_slice %27 {offsets = [8, 0], sizes = [1, 256], strides = [1, 1]} : vector<9x256xf32> to vector<1x256xf32>
      %73 = arith.mulf %71, %72 : vector<1x256xf32>
      %74 = arith.addf %69, %73 : vector<1x256xf32>
      %75 = vector.broadcast %26 : f32 to vector<1x256xf32>
      %76 = arith.addf %74, %75 : vector<1x256xf32>
      %77 = arith.negf %76 : vector<1x256xf32>
      %78 = math.exp %77 : vector<1x256xf32>
      %cst_31 = arith.constant 1.000000e+00 : f32
      %79 = vector.broadcast %cst_31 : f32 to vector<1x256xf32>
      %80 = arith.addf %79, %78 : vector<1x256xf32>
      %81 = arith.divf %79, %80 : vector<1x256xf32>
      %c0_32 = arith.constant 0 : index
      %c0_33 = arith.constant 0 : index
      %c0_34 = arith.constant 0 : index
      %82 = vector.load %arg6[%c0_32, %c0_33, %c0_34] : memref<2x1x256xf32, #tpu.memory_space<vmem>>, vector<1x1x256xf32>
      %83 = vector.shape_cast %82 : vector<1x1x256xf32> to vector<1x256xf32>
      %84 = vector.shape_cast %81 : vector<1x256xf32> to vector<1x1x256xf32>
      tpu.vector_store %arg6[%c0_32, %c0_33, %c0_34], %84 {strides = array<i32>} : memref<2x1x256xf32, #tpu.memory_space<vmem>>, vector<1x1x256xf32>,
      %c1_35 = arith.constant 1 : index
      %c0_36 = arith.constant 0 : index
      %c0_37 = arith.constant 0 : index
      %85 = vector.load %arg7[%c1_35, %c0_36, %c0_37] : memref<2x9x256xf32, #tpu.memory_space<vmem>>, vector<1x9x256xf32>
      %86 = vector.shape_cast %85 : vector<1x9x256xf32> to vector<9x256xf32>
      %cst_38 = arith.constant 0.000000e+00 : f32
      %87 = vector.broadcast %cst_38 : f32 to vector<1x256xf32>
      %88 = vector.extract_strided_slice %86 {offsets = [0, 0], sizes = [1, 256], strides = [1, 1]} : vector<9x256xf32> to vector<1x256xf32>
      %c17_i32_39 = arith.constant 17 : i32
      %89 = tpu.dynamic_rotate %88 by %c17_i32_39 dim 1 : vector<1x256xf32>, i32 -> vector<1x256xf32>
      %90 = vector.extract_strided_slice %27 {offsets = [0, 0], sizes = [1, 256], strides = [1, 1]} : vector<9x256xf32> to vector<1x256xf32>
      %91 = arith.mulf %89, %90 : vector<1x256xf32>
      %92 = arith.addf %87, %91 : vector<1x256xf32>
      %93 = vector.extract_strided_slice %86 {offsets = [1, 0], sizes = [1, 256], strides = [1, 1]} : vector<9x256xf32> to vector<1x256xf32>
      %c16_i32_40 = arith.constant 16 : i32
      %94 = tpu.dynamic_rotate %93 by %c16_i32_40 dim 1 : vector<1x256xf32>, i32 -> vector<1x256xf32>
      %95 = vector.extract_strided_slice %27 {offsets = [1, 0], sizes = [1, 256], strides = [1, 1]} : vector<9x256xf32> to vector<1x256xf32>
      %96 = arith.mulf %94, %95 : vector<1x256xf32>
      %97 = arith.addf %92, %96 : vector<1x256xf32>
      %98 = vector.extract_strided_slice %86 {offsets = [2, 0], sizes = [1, 256], strides = [1, 1]} : vector<9x256xf32> to vector<1x256xf32>
      %c15_i32_41 = arith.constant 15 : i32
      %99 = tpu.dynamic_rotate %98 by %c15_i32_41 dim 1 : vector<1x256xf32>, i32 -> vector<1x256xf32>
      %100 = vector.extract_strided_slice %27 {offsets = [2, 0], sizes = [1, 256], strides = [1, 1]} : vector<9x256xf32> to vector<1x256xf32>
      %101 = arith.mulf %99, %100 : vector<1x256xf32>
      %102 = arith.addf %97, %101 : vector<1x256xf32>
      %103 = vector.extract_strided_slice %86 {offsets = [3, 0], sizes = [1, 256], strides = [1, 1]} : vector<9x256xf32> to vector<1x256xf32>
      %c1_i32_42 = arith.constant 1 : i32
      %104 = tpu.dynamic_rotate %103 by %c1_i32_42 dim 1 : vector<1x256xf32>, i32 -> vector<1x256xf32>
      %105 = vector.extract_strided_slice %27 {offsets = [3, 0], sizes = [1, 256], strides = [1, 1]} : vector<9x256xf32> to vector<1x256xf32>
      %106 = arith.mulf %104, %105 : vector<1x256xf32>
      %107 = arith.addf %102, %106 : vector<1x256xf32>
      %108 = vector.extract_strided_slice %86 {offsets = [4, 0], sizes = [1, 256], strides = [1, 1]} : vector<9x256xf32> to vector<1x256xf32>
      %109 = vector.extract_strided_slice %27 {offsets = [4, 0], sizes = [1, 256], strides = [1, 1]} : vector<9x256xf32> to vector<1x256xf32>
      %110 = arith.mulf %108, %109 : vector<1x256xf32>
      %111 = arith.addf %107, %110 : vector<1x256xf32>
      %112 = vector.extract_strided_slice %86 {offsets = [5, 0], sizes = [1, 256], strides = [1, 1]} : vector<9x256xf32> to vector<1x256xf32>
      %c255_i32_43 = arith.constant 255 : i32
      %113 = tpu.dynamic_rotate %112 by %c255_i32_43 dim 1 : vector<1x256xf32>, i32 -> vector<1x256xf32>
      %114 = vector.extract_strided_slice %27 {offsets = [5, 0], sizes = [1, 256], strides = [1, 1]} : vector<9x256xf32> to vector<1x256xf32>
      %115 = arith.mulf %113, %114 : vector<1x256xf32>
      %116 = arith.addf %111, %115 : vector<1x256xf32>
      %117 = vector.extract_strided_slice %86 {offsets = [6, 0], sizes = [1, 256], strides = [1, 1]} : vector<9x256xf32> to vector<1x256xf32>
      %c241_i32_44 = arith.constant 241 : i32
      %118 = tpu.dynamic_rotate %117 by %c241_i32_44 dim 1 : vector<1x256xf32>, i32 -> vector<1x256xf32>
      %119 = vector.extract_strided_slice %27 {offsets = [6, 0], sizes = [1, 256], strides = [1, 1]} : vector<9x256xf32> to vector<1x256xf32>
      %120 = arith.mulf %118, %119 : vector<1x256xf32>
      %121 = arith.addf %116, %120 : vector<1x256xf32>
      %122 = vector.extract_strided_slice %86 {offsets = [7, 0], sizes = [1, 256], strides = [1, 1]} : vector<9x256xf32> to vector<1x256xf32>
      %c240_i32_45 = arith.constant 240 : i32
      %123 = tpu.dynamic_rotate %122 by %c240_i32_45 dim 1 : vector<1x256xf32>, i32 -> vector<1x256xf32>
      %124 = vector.extract_strided_slice %27 {offsets = [7, 0], sizes = [1, 256], strides = [1, 1]} : vector<9x256xf32> to vector<1x256xf32>
      %125 = arith.mulf %123, %124 : vector<1x256xf32>
      %126 = arith.addf %121, %125 : vector<1x256xf32>
      %127 = vector.extract_strided_slice %86 {offsets = [8, 0], sizes = [1, 256], strides = [1, 1]} : vector<9x256xf32> to vector<1x256xf32>
      %c239_i32_46 = arith.constant 239 : i32
      %128 = tpu.dynamic_rotate %127 by %c239_i32_46 dim 1 : vector<1x256xf32>, i32 -> vector<1x256xf32>
      %129 = vector.extract_strided_slice %27 {offsets = [8, 0], sizes = [1, 256], strides = [1, 1]} : vector<9x256xf32> to vector<1x256xf32>
      %130 = arith.mulf %128, %129 : vector<1x256xf32>
      %131 = arith.addf %126, %130 : vector<1x256xf32>
      %132 = vector.broadcast %26 : f32 to vector<1x256xf32>
      %133 = arith.addf %131, %132 : vector<1x256xf32>
      %134 = arith.negf %133 : vector<1x256xf32>
      %135 = math.exp %134 : vector<1x256xf32>
      %cst_47 = arith.constant 1.000000e+00 : f32
      %136 = vector.broadcast %cst_47 : f32 to vector<1x256xf32>
      %137 = arith.addf %136, %135 : vector<1x256xf32>
      %138 = arith.divf %136, %137 : vector<1x256xf32>
      %c1_48 = arith.constant 1 : index
      %c0_49 = arith.constant 0 : index
      %c0_50 = arith.constant 0 : index
      %139 = vector.load %arg6[%c1_48, %c0_49, %c0_50] : memref<2x1x256xf32, #tpu.memory_space<vmem>>, vector<1x1x256xf32>
      %140 = vector.shape_cast %139 : vector<1x1x256xf32> to vector<1x256xf32>
      %141 = vector.shape_cast %138 : vector<1x256xf32> to vector<1x1x256xf32>
      tpu.vector_store %arg6[%c1_48, %c0_49, %c0_50], %141 {strides = array<i32>} : memref<2x1x256xf32, #tpu.memory_space<vmem>>, vector<1x1x256xf32>,
    } else {
    }
    return
  }
  func.func @transform_0(%arg0: i32, %arg1: i32) -> (i32, i32, i32) {
    %c0_i32 = arith.constant 0 : i32
    %c0_i32_0 = arith.constant 0 : i32
    return %arg0, %arg1, %c0_i32 : i32, i32, i32
  }
  func.func @transform_1(%arg0: i32, %arg1: i32) -> (i32, i32, i32) {
    %c0_i32 = arith.constant 0 : i32
    %c0_i32_0 = arith.constant 0 : i32
    %c0_i32_1 = arith.constant 0 : i32
    return %arg1, %c0_i32, %c0_i32_0 : i32, i32, i32
  }
  func.func @transform_2(%arg0: i32, %arg1: i32) -> (i32, i32) {
    %c0_i32 = arith.constant 0 : i32
    %c0_i32_0 = arith.constant 0 : i32
    %c0_i32_1 = arith.constant 0 : i32
    return %c0_i32, %c0_i32_0 : i32, i32
  }
  func.func @transform_3(%arg0: i32, %arg1: i32) -> (i32, i32) {
    %c0_i32 = arith.constant 0 : i32
    %c0_i32_0 = arith.constant 0 : i32
    %c0_i32_1 = arith.constant 0 : i32
    return %c0_i32, %c0_i32_0 : i32, i32
  }
  func.func @transform_4(%arg0: i32, %arg1: i32) -> (i32, i32, i32) {
    %c0_i32 = arith.constant 0 : i32
    %c0_i32_0 = arith.constant 0 : i32
    %c0_i32_1 = arith.constant 0 : i32
    return %arg0, %c0_i32, %c0_i32_0 : i32, i32, i32
  }
}

</mosaic_0001>

<bundles_post_ra>
// kernel: tpu_custom_call.1
= control target key start
LH: loop header
LB: loop body
LE: loop exit
PB: predicated region body
PF: predicated region fallthrough
CT: control target
= control target key end

     0   :  { %10 = vsyncpa [#allocation5], 0  ;;  %s1043_s0 = inlined_call_operand.hbm [shape: f32[2,8,256], index: 0, kind: input, shape index: {}]   ;;  %s1044_s1 = inlined_call_operand.vmem [shape: f32[1,9,8], index: 1, kind: input, shape index: {}]   ;;  %s1045_s2 = inlined_call_operand.hbm [shape: f32[9,256], index: 2, kind: input, shape index: {}]   ;;  %s1046_s3 = inlined_call_operand.<no memory space> [shape: f32[1,1], index: 3, kind: input, shape index: {}]   ;;  %s1047_s4 = inlined_call_operand.hbm [shape: f32[2,1,256], index: 4, kind: output, shape index: {}]  }
   0x1   :  { %11 = vsyncpa [#allocation8], 0 }
   0x2   :  { %12 = vsyncpa [#allocation6], 0  ;;  %s17_s17 = sshll.u32 %s1043_s0, 4  ;;  %s718_s18 = smov [#allocation4]   ;;  %s18_s17 = int_to_ptr.hbm [resolvable:$true] %s17_s17 }
   0x3   :  { %s19_s19 = sshll.u32 %s718_s18, 4  ;;  %s32_s22 = sshll.u32 %s1045_s2, 4  ;;  %s20_s19 = int_to_ptr.vmem [resolvable:$true] %s19_s19  ;;  %s33_s22 = int_to_ptr.hbm [resolvable:$true] %s32_s22 }
   0x4   :  { %s719_s23 = smov 256   ;;  %s720_s24 = smov 16  }
   0x5   :  { %25 = dma.hbm_to_vmem [thread:$0]  %s18_s17, 512, %s20_s19, [#allocation5], %s719_s23, %s719_s23, %s720_s24  }
   0x6   :  { %s721_s25 = smov [#allocation7]  }
   0x7   :  { %s34_s26 = sshll.u32 %s721_s25, 4  ;;  %s35_s26 = int_to_ptr.vmem [resolvable:$true] %s34_s26 }
   0x8   :  { %40 = dma.hbm_to_vmem [thread:$0]  %s33_s22, 512, %s35_s26, [#allocation8], %s719_s23, %s719_s23, %s720_s24  }
   0x9   :  { %712 = dma.done.wait [#allocation5], 512  }
   0xa   :  { %713 = vsyncadd [#allocation5], 4294966784 }
   0xb   :  { %714 = dma.done.wait [#allocation8], 512  }
   0xc   :  { %715 = vsyncadd [#allocation8], 4294966784  ;;  %v722_v0 = vmov 0.0   ;;  %vm71_vm0 = vcmask 64512   ;;  %v69_v1 = vld [vmem:[#allocation4] sm:$0xff]  ;;  %v70_v3 = vld [vmem:[#allocation4 + $0x8] sm:$0xff] }
   0xd   :  { %57 = vst [vmem:[#allocation2 + $0x18] sm:$0x1] %v722_v0  ;;  %v63_v2 = vld [vmem:[%s1044_s1] sm:$0xff]  ;;  %93 = vmatpush.msra.mxu0 %v69_v1  ;;  %116 = vmatpush.msra.mxu1 %v70_v3  ;;  %v138_v4 = vld [vmem:[#allocation4 + $0x10] sm:$0xff]  ;;  %v139_v5 = vld [vmem:[#allocation4 + $0x18] sm:$0xff]  ;;  %s723_s29 = smov 17   ;;  %v210_v3 = vlaneseq }
   0xe   :  { %58 = vst [vmem:[#allocation2 + $0x10] sm:$0x1] %v722_v0  ;;  %597 = vmatmul.msk.f32.vlgmr.msra.gmra.mxu0 %vm71_vm0, %v63_v2  ;;  %599 = vmatmul.msk.f32.vlgmr.msra.gmra.mxu1 %vm71_vm0, %v63_v2  ;;  %v64_v6 = vld [vmem:[%s1044_s1 + $0x8] sm:$0x1]  ;;  %s724_s1 = smov 15   ;;  %s725_s30 = smov 127  }
   0xf   :  { %61 = vst [vmem:[#allocation2 + $0x28] sm:$0x1] %v722_v0  ;;  %155 = vmatpush.msra.mxu2 %v138_v4  ;;  %178 = vmatpush.msra.mxu3 %v139_v5  ;;  %s726_s5 = smov 113   ;;  %s727_s6 = smov 1  }
  0x10   :  { %62 = vst [vmem:[#allocation2 + $0x38] sm:$0x1] %v722_v0  ;;  %601 = vmatmul.msk.f32.vlgmr.msra.gmra.mxu2 %vm71_vm0, %v63_v2  ;;  %603 = vmatmul.msk.f32.vlgmr.msra.gmra.mxu3 %vm71_vm0, %v63_v2  ;;  %s728_s7 = smov 112   ;;  %s729_s8 = smov 111  }
  0x11   :  { %s583_s14 = sshll.u32 %s1047_s4, 4  ;;  %s731_s15 = smov 32   ;;  %s584_s14 = int_to_ptr.hbm [resolvable:$true] %s583_s14 }
  0x12   :  { %s732_s16 = smov 2  }
  0x14   :  { %v67_v20 = vld [vmem:[#allocation2 + $0x18] sm:$0x1] }
  0x15   :  { %v68_v37 = vld [vmem:[#allocation2 + $0x10] sm:$0x1] }
  0x16   :  { %598 = vmatmul.msk.f32.gmra.mxu0 %vm71_vm0, %v64_v6  ;;  %600 = vmatmul.msk.f32.gmra.mxu1 %vm71_vm0, %v64_v6  ;;  %v135_v25 = vld [vmem:[#allocation2 + $0x28] sm:$0x1] }
  0x17   :  { %v136_v27 = vld [vmem:[#allocation2 + $0x38] sm:$0x1] }
  0x18   :  { %602 = vmatmul.msk.f32.gmra.mxu2 %vm71_vm0, %v64_v6  ;;  %604 = vmatmul.msk.f32.gmra.mxu3 %vm71_vm0, %v64_v6  ;;  %v859_v6 = vand.u32 127, %v210_v3  ;;  %vm402_vm0 = vcmask 1040384  }
  0x1a   :  { %vm229_vm1 = vcmp.lt.s32.totalorder %v859_v6, 16  ;;  %vm212_vm2 = vcmp.lt.s32.totalorder %v859_v6, 17  ;;  %vm250_vm3 = vcmp.lt.s32.totalorder %v859_v6, 15  ;;  %vm269_vm4 = vcmp.lt.s32.totalorder %v859_v6, 1 }
  0x1b   :  { %vm298_vm5 = vcmp.lt.s32.totalorder %v859_v6, 127  ;;  %vm317_vm6 = vcmp.lt.s32.totalorder %v859_v6, 113  ;;  %vm336_vm7 = vcmp.lt.s32.totalorder %v859_v6, 112  ;;  %vm351_vm8 = vcmp.lt.s32.totalorder %v859_v6, 111 }
  0x8b   :  { %v780_v7 = vpop.f32.mrf.mxu0  ;;  %v782_v8 = vpop.f32.mrf.mxu1 }
  0x8c   :  { %206 = vrot.lane.b32.xlu0 %v780_v7, %s723_s29  ;;  %v242_v9 = vrot.slane %v780_v7, 2  ;;  %v221_v10 = vrot.slane %v780_v7, 1  ;;  %v291_v13 = vrot.slane %v782_v8, 5  ;;  %v222_v14 = vrot.slane %v782_v8, 1 }
  0x8d   :  { %v243_v15 = vrot.slane %v782_v8, 2  ;;  %v309_v16 = vrot.slane %v780_v7, 6  ;;  %v262_v17 = vrot.slane %v782_v8, 3  ;;  %v261_v18 = vrot.slane %v780_v7, 3 }
  0x8e   :  { %246 = vrot.lane.b32.xlu2 %v242_v9, %s724_s1  ;;  %225 = vrot.lane.b32.xlu1 %v221_v10, %s720_s24  ;;  %v290_v19 = vrot.slane %v780_v7, 5  ;;  %v310_v23 = vrot.slane %v782_v8, 6  ;;  %v329_v24 = vrot.slane %v782_v8, 7  ;;  %v328_v31 = vrot.slane %v780_v7, 7  ;;  %v864_v10 = vld [vmem:[#allocation7] sm:$0xff] }
  0x93   :  { %v790_v11 = vpop.f32.mrf.mxu2  ;;  %v792_v12 = vpop.f32.mrf.mxu3 }
  0x94   :  { %208 = vrot.lane.b32.xlu0 %v782_v8, %s723_s29  ;;  %v98_v21 = vpop.f32.mrf.mxu0  ;;  %v441_v32 = vrot.slane %v792_v12, 2  ;;  %v427_v33 = vrot.slane %v792_v12, 1  ;;  %v426_v34 = vrot.slane %v790_v11, 1  ;;  %v454_v35 = vrot.slane %v790_v11, 3  ;;  %v121_v38 = vpop.f32.mrf.mxu1 }
  0x95   :  { %v126_v22 = vadd.f32 %v98_v21, %v67_v20  ;;  %v440_v36 = vrot.slane %v790_v11, 2  ;;  %v127_v39 = vadd.f32 %v121_v38, %v68_v37  ;;  %v455_v40 = vrot.slane %v792_v12, 3 }
  0x96   :  { %296 = vrot.lane.b32.xlu2 %v291_v13, %s725_s30  ;;  %227 = vrot.lane.b32.xlu1 %v222_v14, %s720_s24  ;;  %v493_v41 = vrot.slane %v792_v12, 6  ;;  %v479_v42 = vrot.slane %v792_v12, 5  ;;  %v478_v43 = vrot.slane %v790_v11, 5  ;;  %v506_v44 = vrot.slane %v790_v11, 7  ;;  %v866_v13 = vld [vmem:[#allocation7 + $0x8] sm:$0xff] }
  0x97   :  { %130 = vst [vmem:[#allocation2 + $0x18] sm:$0x1] %v126_v22  ;;  %v492_v45 = vrot.slane %v790_v11, 6  ;;  %v507_v46 = vrot.slane %v792_v12, 7  ;;  %v234_v14 = vrot.slane %v864_v10, 1  ;;  %v254_v20 = vrot.slane %v866_v13, 2 }
  0x98   :  { %131 = vst [vmem:[#allocation2 + $0x10] sm:$0x1] %v127_v39 }
  0x9b   :  { %v160_v26 = vpop.f32.mrf.mxu2  ;;  %v183_v28 = vpop.f32.mrf.mxu3 }
  0x9c   :  { %248 = vrot.lane.b32.xlu0 %v243_v15, %s724_s1  ;;  %v188_v29 = vadd.f32 %v160_v26, %v135_v25  ;;  %v189_v30 = vadd.f32 %v183_v28, %v136_v27  ;;  %v235_v15 = vrot.slane %v866_v13, 1  ;;  %v272_v28 = vrot.slane %v864_v10, 3 }
  0x9e   :  { %313 = vrot.lane.b32.xlu2 %v309_v16, %s726_s5  ;;  %267 = vrot.lane.b32.xlu1 %v262_v17, %s727_s6  ;;  %192 = vst [vmem:[#allocation2 + $0x28] sm:$0x1] %v188_v29  ;;  %v204_v47 = vld [vmem:[#allocation2 + $0x18] sm:$0x1]  ;;  %v273_v29 = vrot.slane %v866_v13, 3 }
  0x9f   :  { %193 = vst [vmem:[#allocation2 + $0x38] sm:$0x1] %v189_v30  ;;  %v205_v48 = vld [vmem:[#allocation2 + $0x10] sm:$0x1] }
  0xa4   :  { %265 = vrot.lane.b32.xlu0 %v261_v18, %s727_s6 }
  0xa5   :  { %v412_v49 = vld [vmem:[#allocation2 + $0x28] sm:$0x1] }
  0xa6   :  { %414 = vrot.lane.b32.xlu2 %v790_v11, %s723_s29  ;;  %294 = vrot.lane.b32.xlu1 %v290_v19, %s725_s30  ;;  %v413_v50 = vld [vmem:[#allocation2 + $0x38] sm:$0x1]  ;;  %v253_v19 = vrot.slane %v864_v10, 2 }
  0xac   :  { %315 = vrot.lane.b32.xlu0 %v310_v23, %s726_s5 }
  0xae   :  { %416 = vrot.lane.b32.xlu2 %v792_v12, %s723_s29  ;;  %334 = vrot.lane.b32.xlu1 %v329_v24, %s728_s7 }
  0xb4   :  { %332 = vrot.lane.b32.xlu0 %v328_v31, %s728_s7 }
  0xb6   :  { %446 = vrot.lane.b32.xlu2 %v441_v32, %s724_s1  ;;  %432 = vrot.lane.b32.xlu1 %v427_v33, %s720_s24  ;;  %v280_v32 = vmul.f32 %v864_v10, %v780_v7  ;;  %v281_v33 = vmul.f32 %v866_v13, %v782_v8 }
  0xbc   :  { %430 = vrot.lane.b32.xlu0 %v426_v34, %s720_s24 }
  0xbe   :  { %458 = vrot.lane.b32.xlu2 %v454_v35, %s727_s6  ;;  %444 = vrot.lane.b32.xlu1 %v440_v36, %s724_s1 }
  0xc4   :  { %460 = vrot.lane.b32.xlu0 %v455_v40, %s727_s6 }
  0xc6   :  { %498 = vrot.lane.b32.xlu2 %v493_v41, %s726_s5  ;;  %484 = vrot.lane.b32.xlu1 %v479_v42, %s725_s30 }
  0xcc   :  { %482 = vrot.lane.b32.xlu0 %v478_v43, %s725_s30  ;;  %v284_v43 = vrot.slane %v280_v32, 4 }
  0xce   :  { %510 = vrot.lane.b32.xlu2 %v506_v44, %s728_s7  ;;  %496 = vrot.lane.b32.xlu1 %v492_v45, %s726_s5  ;;  %v285_v44 = vrot.slane %v281_v33, 4 }
  0xd4   :  { %512 = vrot.lane.b32.xlu0 %v507_v46, %s728_s7 }
  0xd6   :  { %347 = vrot.lane.b32.xlu1 %v204_v47, %s729_s8  ;;  %349 = vrot.lane.b32.xlu2 %v205_v48, %s729_s8 }
  0xdc   :  { %520 = vrot.lane.b32.xlu0 %v412_v49, %s729_s8  ;;  %v301_v49 = vrot.slane %v864_v10, 5 }
  0xde   :  { %522 = vrot.lane.b32.xlu1 %v413_v50, %s729_s8  ;;  %v302_v50 = vrot.slane %v866_v13, 5 }
  0xe8   :  { %v247_v51 = vpop.permute.xlu2 %246 }
  0xf0   :  { %v844_v52 = vpop.permute.xlu2 %296 }
  0xf8   :  { %v846_v55 = vpop.permute.xlu2 %313 }
  0xfe   :  { %v207_v53 = vpop.permute.xlu0 %206 }
 0x100   :  { %v226_v54 = vpop.permute.xlu1 %225  ;;  %v415_v58 = vpop.permute.xlu2 %414 }
 0x106   :  { %v209_v56 = vpop.permute.xlu0 %208 }
 0x107   :  { %v213_v22 = vsel %vm212_vm2, %v207_v53, %v209_v56  ;;  %v214_v23 = vsel %vm212_vm2, %v209_v56, %v207_v53 }
 0x108   :  { %v228_v57 = vpop.permute.xlu1 %227  ;;  %v417_v61 = vpop.permute.xlu2 %416  ;;  %v215_v34 = vmul.f32 %v214_v23, %v864_v10  ;;  %v216_v35 = vmul.f32 %v213_v22, %v866_v13 }
 0x109   :  { %v230_v17 = vsel %vm229_vm1, %v226_v54, %v228_v57  ;;  %v231_v18 = vsel %vm229_vm1, %v228_v57, %v226_v54  ;;  %v419_v48 = vsel %vm212_vm2, %v417_v61, %v415_v58  ;;  %v418_v53 = vsel %vm212_vm2, %v415_v58, %v417_v61 }
 0x10a   :  { %v238_v26 = vmul.f32 %v234_v14, %v231_v18  ;;  %v239_v27 = vmul.f32 %v235_v15, %v230_v17  ;;  %v320_v57 = vrot.slane %v864_v10, 6  ;;  %v339_v17 = vrot.slane %v864_v10, 7 }
 0x10b   :  { %v421_v61 = vmul.f32 %v418_v53, %v866_v13  ;;  %v201_v53 = vld [vmem:[#allocation7 + $0x18] sm:$0x1]  ;;  %vm1021_vm2 = vcmp.lt.s32.totalorder %v210_v3, 256 }
 0x10c   :  { %v240_v39 = vadd.f32 %v238_v26, %v215_v34  ;;  %v241_v40 = vadd.f32 %v239_v27, %v216_v35 }
 0x10e   :  { %v249_v59 = vpop.permute.xlu0 %248 }
 0x10f   :  { %v251_v24 = vsel %vm250_vm3, %v247_v51, %v249_v59  ;;  %v252_v25 = vsel %vm250_vm3, %v249_v59, %v247_v51  ;;  %v321_v59 = vrot.slane %v866_v13, 6 }
 0x110   :  { %v268_v60 = vpop.permute.xlu1 %267  ;;  %v852_v1 = vpop.permute.xlu2 %446  ;;  %v257_v36 = vmul.f32 %v253_v19, %v252_v25  ;;  %v258_v37 = vmul.f32 %v254_v20, %v251_v24 }
 0x112   :  { %v259_v8 = vadd.f32 %v257_v36, %v240_v39  ;;  %v260_v45 = vadd.f32 %v258_v37, %v241_v40  ;;  %v469_v36 = vmul.f32 %v866_v13, %v792_v12 }
 0x116   :  { %v266_v62 = vpop.permute.xlu0 %265 }
 0x117   :  { %v270_v30 = vsel %vm269_vm4, %v266_v62, %v268_v60  ;;  %v271_v31 = vsel %vm269_vm4, %v268_v60, %v266_v62  ;;  %v420_v62 = vmul.f32 %v419_v48, %v864_v10 }
 0x118   :  { %v848_v63 = vpop.permute.xlu1 %294  ;;  %v861_v9 = vpop.permute.xlu2 %458  ;;  %v276_v41 = vmul.f32 %v272_v28, %v271_v31  ;;  %v277_v42 = vmul.f32 %v273_v29, %v270_v30  ;;  %v340_v30 = vrot.slane %v866_v13, 7 }
 0x11a   :  { %v278_v54 = vadd.f32 %v276_v41, %v259_v8  ;;  %v279_v56 = vadd.f32 %v277_v42, %v260_v45  ;;  %v468_v41 = vmul.f32 %v864_v10, %v790_v11 }
 0x11c   :  { %v289_v22 = vadd.f32 %v285_v44, %v279_v56  ;;  %v472_v11 = vrot.slane %v468_v41, 4 }
 0x11e   :  { %v850_v0 = vpop.permute.xlu0 %315 }
 0x11f   :  { %v318_v23 = vsel %vm317_vm6, %v846_v55, %v850_v0 }
 0x120   :  { %v854_v2 = vpop.permute.xlu1 %334  ;;  %v901_v38 = vpop.permute.xlu2 %498 }
 0x126   :  { %v856_v4 = vpop.permute.xlu0 %332 }
 0x128   :  { %v433_v5 = vpop.permute.xlu1 %432  ;;  %v511_v24 = vpop.permute.xlu2 %510 }
 0x12e   :  { %v431_v16 = vpop.permute.xlu0 %430 }
 0x12f   :  { %v435_v46 = vsel %vm229_vm1, %v433_v5, %v431_v16  ;;  %v434_v51 = vsel %vm229_vm1, %v431_v16, %v433_v5  ;;  %v299_v5 = vsel %vm298_vm5, %v848_v63, %v844_v52  ;;  %v288_v16 = vadd.f32 %v284_v43, %v278_v54 }
 0x130   :  { %v445_v21 = vpop.permute.xlu1 %444  ;;  %v436_v60 = vmul.f32 %v435_v46, %v234_v14  ;;  %v437_v18 = vmul.f32 %v434_v51, %v235_v15  ;;  %v300_v14 = vsel %vm298_vm5, %v844_v52, %v848_v63  ;;  %v319_v52 = vsel %vm317_vm6, %v850_v0, %v846_v55  ;;  %v350_v45 = vpop.permute.xlu2 %349  ;;  %v200_v51 = vld [vmem:[#allocation7 + $0x10] sm:$0x1] }
 0x131   :  { %v449_v58 = vsel %vm250_vm3, %v852_v1, %v445_v21  ;;  %v448_v15 = vsel %vm250_vm3, %v445_v21, %v852_v1  ;;  %v305_v27 = vmul.f32 %v301_v49, %v299_v5  ;;  %v306_v34 = vmul.f32 %v302_v50, %v300_v14 }
 0x132   :  { %v438_v63 = vadd.f32 %v436_v60, %v420_v62  ;;  %v450_v1 = vmul.f32 %v449_v58, %v253_v19  ;;  %v439_v31 = vadd.f32 %v437_v18, %v421_v61  ;;  %v451_v32 = vmul.f32 %v448_v15, %v254_v20 }
 0x133   :  { %v337_v55 = vsel %vm336_vm7, %v856_v4, %v854_v2  ;;  %v338_v0 = vsel %vm336_vm7, %v854_v2, %v856_v4  ;;  %v324_v19 = vmul.f32 %v320_v57, %v318_v23  ;;  %v325_v20 = vmul.f32 %v321_v59, %v319_v52 }
 0x134   :  { %v307_v37 = vadd.f32 %v305_v27, %v288_v16  ;;  %v308_v39 = vadd.f32 %v306_v34, %v289_v22  ;;  %v452_v40 = vadd.f32 %v450_v1, %v438_v63  ;;  %v343_v2 = vmul.f32 %v339_v17, %v337_v55 }
 0x135   :  { %v344_v4 = vmul.f32 %v340_v30, %v338_v0  ;;  %v473_v46 = vrot.slane %v469_v36, 4 }
 0x136   :  { %v461_v7 = vpop.permute.xlu0 %460  ;;  %v326_v43 = vadd.f32 %v324_v19, %v307_v37  ;;  %v327_v12 = vadd.f32 %v325_v20, %v308_v39 }
 0x137   :  { %v463_v25 = vsel %vm269_vm4, %v461_v7, %v861_v9  ;;  %v462_v21 = vsel %vm269_vm4, %v861_v9, %v461_v7 }
 0x138   :  { %v485_v47 = vpop.permute.xlu1 %484  ;;  %v464_v9 = vmul.f32 %v463_v25, %v272_v28  ;;  %v465_v35 = vmul.f32 %v462_v21, %v273_v29  ;;  %v453_v28 = vadd.f32 %v451_v32, %v439_v31  ;;  %v345_v54 = vadd.f32 %v343_v2, %v326_v43 }
 0x139   :  { %v346_v56 = vadd.f32 %v344_v4, %v327_v12 }
 0x13a   :  { %v466_v7 = vadd.f32 %v464_v9, %v452_v40  ;;  %v467_v44 = vadd.f32 %v465_v35, %v453_v28 }
 0x13c   :  { %v476_v18 = vadd.f32 %v472_v11, %v466_v7  ;;  %v477_v5 = vadd.f32 %v473_v46, %v467_v44 }
 0x13e   :  { %v483_v26 = vpop.permute.xlu0 %482 }
 0x13f   :  { %v486_v42 = vsel %vm298_vm5, %v483_v26, %v485_v47  ;;  %v487_v29 = vsel %vm298_vm5, %v485_v47, %v483_v26 }
 0x140   :  { %v497_v33 = vpop.permute.xlu1 %496  ;;  %v488_v48 = vmul.f32 %v486_v42, %v301_v49  ;;  %v489_v60 = vmul.f32 %v487_v29, %v302_v50 }
 0x141   :  { %v500_v47 = vsel %vm317_vm6, %v497_v33, %v901_v38  ;;  %v501_v58 = vsel %vm317_vm6, %v901_v38, %v497_v33  ;;  %v358_v38 = vstv %s1046_s3  ;;  %s730_s3 = smov [#allocation9]  }
 0x142   :  { %v490_v16 = vadd.f32 %v488_v48, %v476_v18  ;;  %v502_v22 = vmul.f32 %v500_v47, %v320_v57  ;;  %v491_v25 = vadd.f32 %v489_v60, %v477_v5  ;;  %v503_v26 = vmul.f32 %v501_v58, %v321_v59  ;;  %s581_s11 = sshll.u32 %s730_s3, 4  ;;  %s582_s11 = int_to_ptr.vmem [resolvable:$true] %s581_s11 }
 0x144   :  { %v504_v32 = vadd.f32 %v502_v22, %v490_v16  ;;  %v505_v33 = vadd.f32 %v503_v26, %v491_v25 }
 0x146   :  { %v513_v8 = vpop.permute.xlu0 %512 }
 0x147   :  { %v514_v50 = vsel %vm336_vm7, %v511_v24, %v513_v8  ;;  %v515_v23 = vsel %vm336_vm7, %v513_v8, %v511_v24 }
 0x148   :  { %v348_v62 = vpop.permute.xlu1 %347  ;;  %v516_v1 = vmul.f32 %v514_v50, %v339_v17  ;;  %v517_v21 = vmul.f32 %v515_v23, %v340_v30 }
 0x149   :  { %v352_v49 = vsel %vm351_vm8, %v348_v62, %v350_v45  ;;  %v353_v61 = vsel %vm351_vm8, %v350_v45, %v348_v62 }
 0x14a   :  { %v354_v14 = vmul.f32 %v352_v49, %v200_v51  ;;  %v355_v15 = vmul.f32 %v353_v61, %v201_v53  ;;  %v518_v0 = vadd.f32 %v516_v1, %v504_v32  ;;  %v519_v59 = vadd.f32 %v517_v21, %v505_v33 }
 0x14c   :  { %v356_v52 = vadd.f32 %v354_v14, %v345_v54  ;;  %v357_v63 = vadd.f32 %v355_v15, %v346_v56 }
 0x14e   :  { %v359_v27 = vadd.f32 %v358_v38, %v356_v52  ;;  %v360_v31 = vadd.f32 %v358_v38, %v357_v63  ;;  %v521_v57 = vpop.permute.xlu0 %520 }
 0x150   :  { %v605_v24 = vmul.f32 -1.442695, %v359_v27  ;;  %v606_v34 = vmul.f32 -1.442695, %v360_v31  ;;  %v523_v55 = vpop.permute.xlu1 %522 }
 0x151   :  { %v524_v9 = vsel %vm351_vm8, %v521_v57, %v523_v55  ;;  %v525_v13 = vsel %vm351_vm8, %v523_v55, %v521_v57 }
 0x152   :  { %624 = vpow2.f32 %v605_v24  ;;  %v526_v10 = vmul.f32 %v524_v9, %v200_v51  ;;  %v527_v17 = vmul.f32 %v525_v13, %v201_v53 }
 0x153   :  { %626 = vpow2.f32 %v606_v34 }
 0x154   :  { %v528_v30 = vadd.f32 %v526_v10, %v518_v0  ;;  %v529_v19 = vadd.f32 %v527_v17, %v519_v59 }
 0x156   :  { %v530_v20 = vadd.f32 %v528_v30, %v358_v38  ;;  %v531_v35 = vadd.f32 %v529_v19, %v358_v38 }
 0x158   :  { %v625_v36 = vpop.eup %624  ;;  %v607_v37 = vmul.f32 -1.442695, %v530_v20  ;;  %v608_v41 = vmul.f32 -1.442695, %v531_v35 }
 0x159   :  { %v627_v39 = vpop.eup %626  ;;  %v367_v40 = vadd.f32 1.0, %v625_v36 }
 0x15a   :  { %v368_v2 = vadd.f32 1.0, %v627_v39  ;;  %628 = vpow2.f32 %v607_v37 }
 0x15b   :  { %630 = vrcp.f32 %v367_v40  ;;  %vm374_vm11 = vweird.f32 %v367_v40  ;;  %v380_v53 = vand.u32 2147483648, %v367_v40  ;;  %v378_v60 = vand.u32 2147483647, %v367_v40 }
 0x15c   :  { %632 = vrcp.f32 %v368_v2  ;;  %v395_v11 = vand.u32 2147483648, %v368_v2  ;;  %v393_v48 = vand.u32 2147483647, %v368_v2  ;;  %vm389_vm12 = vweird.f32 %v368_v2 }
 0x15d   :  { %634 = vpow2.f32 %v608_v41  ;;  %v381_v50 = vor.u32 1.1754944e-38, %v380_v53  ;;  %vm379_vm1 = vcmp.eq.f32.partialorder %v378_v60, 8.507059e+37 }
 0x15e   :  { %v396_v62 = vor.u32 1.1754944e-38, %v395_v11  ;;  %vm394_vm15 = vcmp.eq.f32.partialorder %v393_v48, 8.507059e+37 }
 0x160   :  { %v629_v6 = vpop.eup %628 }
 0x161   :  { %v631_v4 = vpop.eup %630  ;;  %v1010_v28 = vadd.f32 1.0, %v629_v6 }
 0x162   :  { %v633_v42 = vpop.eup %632  ;;  %v370_v7 = vmul.f32 %v631_v4, %v367_v40  ;;  %vm375_vm9 = vweird.f32 %v631_v4 }
 0x163   :  { %v635_v29 = vpop.eup %634  ;;  %v385_v43 = vmul.f32 %v633_v42, %v368_v2  ;;  %636 = vrcp.f32 %v1010_v28  ;;  %vm390_vm10 = vweird.f32 %v633_v42  ;;  %vm1013_vm13 = vmor %vm374_vm11, %vm375_vm9  ;;  %vm545_vm5 = vweird.f32 %v1010_v28 }
 0x164   :  { %v371_v12 = vsub.f32 1.0, %v370_v7  ;;  %v539_v44 = vadd.f32 1.0, %v635_v29  ;;  %vm391_vm14 = vmor %vm389_vm12, %vm390_vm10  ;;  %v551_v3 = vand.u32 2147483648, %v1010_v28  ;;  %v549_v31 = vand.u32 2147483647, %v1010_v28 }
 0x165   :  { %v386_v8 = vsub.f32 1.0, %v385_v43 }
 0x166   :  { %v372_v45 = vmul.f32 %v631_v4, %v371_v12  ;;  %638 = vrcp.f32 %v539_v44  ;;  %v566_v52 = vand.u32 2147483648, %v539_v44  ;;  %v564_v21 = vand.u32 2147483647, %v539_v44 }
 0x167   :  { %v387_v46 = vmul.f32 %v633_v42, %v386_v8  ;;  %vm560_vm6 = vweird.f32 %v539_v44  ;;  %v552_v34 = vor.u32 1.1754944e-38, %v551_v3  ;;  %vm550_vm10 = vcmp.eq.f32.partialorder %v549_v31, 8.507059e+37 }
 0x168   :  { %v373_v51 = vadd.f32 %v631_v4, %v372_v45  ;;  %v567_v32 = vor.u32 1.1754944e-38, %v566_v52  ;;  %vm565_vm9 = vcmp.eq.f32.partialorder %v564_v21, 8.507059e+37 }
 0x169   :  { %v637_v54 = vpop.eup %636  ;;  %v388_v47 = vadd.f32 %v633_v42, %v387_v46 }
 0x16a   :  { %v541_v18 = vmul.f32 %v637_v54, %v1010_v28  ;;  %v377_v58 = vsel %vm1013_vm13, %v631_v4, %v373_v51  ;;  %vm546_vm3 = vweird.f32 %v637_v54 }
 0x16b   :  { %v392_v49 = vsel %vm391_vm14, %v633_v42, %v388_v47  ;;  %v382_v38 = vsel %vm379_vm1, %v381_v50, %v377_v58  ;;  %vm1030_vm7 = vmor %vm545_vm5, %vm546_vm3 }
 0x16c   :  { %v639_v61 = vpop.eup %638  ;;  %v542_v5 = vsub.f32 1.0, %v541_v18  ;;  %v397_v14 = vsel %vm394_vm15, %v396_v62, %v392_v49 }
 0x16d   :  { %v556_v15 = vmul.f32 %v639_v61, %v539_v44  ;;  %v401_v16 = vrot.slane %v397_v14, 7  ;;  %vm561_vm4 = vweird.f32 %v639_v61 }
 0x16e   :  { %v543_v23 = vmul.f32 %v637_v54, %v542_v5  ;;  %vm562_vm8 = vmor %vm560_vm6, %vm561_vm4 }
 0x16f   :  { %v557_v25 = vsub.f32 1.0, %v556_v15  ;;  %v403_v26 = vsel %vm402_vm0, %v382_v38, %v401_v16 }
 0x170   :  { %409 = vst.msk [vmem:[#allocation9] sm:$0x3] %vm1021_vm2, %v403_v26  ;;  %v544_v1 = vadd.f32 %v637_v54, %v543_v23 }
 0x171   :  { %v558_v63 = vmul.f32 %v639_v61, %v557_v25 }
 0x172   :  { %v548_v33 = vsel %vm1030_vm7, %v637_v54, %v544_v1 }
 0x173   :  { %v559_v57 = vadd.f32 %v639_v61, %v558_v63  ;;  %v553_v9 = vsel %vm550_vm10, %v552_v34, %v548_v33 }
 0x175   :  { %v563_v24 = vsel %vm562_vm8, %v639_v61, %v559_v57 }
 0x176   :  { %v568_v55 = vsel %vm565_vm9, %v567_v32, %v563_v24 }
 0x177   :  { %v572_v0 = vrot.slane %v568_v55, 7 }
 0x179   :  { %v573_v13 = vsel %vm402_vm0, %v553_v9, %v572_v0 }
 0x17a   :  { %576 = vst.msk [vmem:[#allocation9 + $0x2] sm:$0x3] %vm1021_vm2, %v573_v13 }
 0x17b   :  { %589 = dma.vmem_to_hbm [thread:$0]  %s582_s11, 64, %s584_s14, [#allocation6], %s731_s15, %s731_s15, %s732_s16  }
 0x17c   :  { %716 = dma.done.wait [#allocation6], 64  }
 0x17d   :  { %717 = vsyncadd [#allocation6], 4294967232 }
 0x17e   :  { %594 = vsyncpa [#allocation5], 1 }
 0x17f   :  { %595 = vsyncpa [#allocation8], 1 }
 0x180   :  { %596 = vsyncpa [#allocation6], 1 }

</bundles_post_ra>
